<compile_context>
chip_gen: v5e
topology: v5e:2x2
jax: 0.10.0
libtpu: 0.0.40
codegen_flags: <defaults>
</compile_context>

<pallas_src>
import functools

import jax
import jax.numpy as jnp
from jax.experimental import pallas as pl
from jax.experimental.pallas import tpu as pltpu


def _pick_tile(dim, unit, max_tile):
    """Largest multiple of `unit` that divides `dim` and is <= max_tile.

    Falls back to the full dim (always legal for a BlockSpec) when `dim` is
    not a multiple of `unit`.
    """
    if dim % unit != 0:
        return dim
    best = unit
    t = unit
    limit = min(dim, max_tile)
    while t <= limit:
        if dim % t == 0:
            best = t
        t += unit
    return best


# ----------------------------- pass 1: stats ------------------------------ #
def _bn_stats_kernel(x_ref, gamma_ref, beta_ref, mm_ref, mv_ref,
                     scale_ref, shift_ref, new_mm_ref, new_mv_ref,
                     sum_ref, sq_ref, *, eps, momentum, m_total):
    n = pl.program_id(1)
    h = pl.program_id(2)
    is_first = jnp.logical_and(n == 0, h == 0)
    is_last = jnp.logical_and(n == pl.num_programs(1) - 1,
                              h == pl.num_programs(2) - 1)

    @pl.when(is_first)
    def _():
        sum_ref[...] = jnp.zeros_like(sum_ref)
        sq_ref[...] = jnp.zeros_like(sq_ref)

    x = x_ref[...].astype(jnp.float32)                       # (C_TILE, HW_TILE)
    sum_ref[...] += jnp.sum(x, axis=-1, keepdims=True)       # (C_TILE, 1)
    sq_ref[...] += jnp.sum(x * x, axis=-1, keepdims=True)    # (C_TILE, 1)

    @pl.when(is_last)
    def _():
        inv_m = 1.0 / m_total
        mean = sum_ref[...] * inv_m
        # Single-pass E[x^2] - E[x]^2 in f32; clamp to guard tiny negatives.
        var = jnp.maximum(sq_ref[...] * inv_m - mean * mean, 0.0)
        inv_std = jax.lax.rsqrt(var + eps)

        gamma = gamma_ref[...].astype(jnp.float32)
        beta = beta_ref[...].astype(jnp.float32)
        scale = gamma * inv_std
        scale_ref[...] = scale
        shift_ref[...] = beta - mean * scale

        mm = mm_ref[...].astype(jnp.float32)
        mv = mv_ref[...].astype(jnp.float32)
        new_mm_ref[...] = momentum * mm + (1.0 - momentum) * mean
        new_mv_ref[...] = momentum * mv + (1.0 - momentum) * var


# --------------------------- pass 2: normalize ----------------------------- #
def _bn_apply_kernel(x_ref, scale_ref, shift_ref, y_ref):
    x = x_ref[...].astype(jnp.float32)                        # (C_TILE, HW_TILE)
    y = x * scale_ref[...] + shift_ref[...]
    y_ref[...] = y.astype(y_ref.dtype)


def batch_norm_pallas(x_nchw, gamma, beta, moving_mean, moving_var,
                      eps=1e-5, momentum=0.9):
    """Training-mode batch norm over a 4D NCHW input.

    gamma/beta/moving_mean/moving_var have PyTorch shape (1, C, 1, 1).
    Returns (Y in NCHW, new_moving_mean, new_moving_var) with matching shapes.
    """
    N, C, H, W = x_nchw.shape
    HW = H * W
    M = N * HW

    # Free reshape (merges trailing contiguous dims) -- no HBM transpose pass.
    x3 = x_nchw.reshape(N, C, HW)
    g = gamma.reshape(C, 1).astype(jnp.float32)
    b = beta.reshape(C, 1).astype(jnp.float32)
    mm = moving_mean.reshape(C, 1).astype(jnp.float32)
    mv = moving_var.reshape(C, 1).astype(jnp.float32)

    C_TILE = _pick_tile(C, 8, 128)       # sublane axis: multiple of 8 or full C
    HW_TILE = _pick_tile(HW, 128, 2048)  # lane axis: multiple of 128 or full HW
    nc = C // C_TILE
    nh = HW // HW_TILE
    grid = (nc, N, nh)

    x_spec = pl.BlockSpec((None, C_TILE, HW_TILE), lambda c, n, h: (n, c, h))
    ch_spec = pl.BlockSpec((C_TILE, 1), lambda c, n, h: (c, 0))

    # ---- pass 1: per-channel stats -> scale/shift + running-stat updates ----
    stats_kernel = functools.partial(
        _bn_stats_kernel, eps=eps, momentum=momentum, m_total=float(M))

    scale, shift, new_mm, new_mv = pl.pallas_call(
        stats_kernel,
        out_shape=(
            jax.ShapeDtypeStruct((C, 1), jnp.float32),
            jax.ShapeDtypeStruct((C, 1), jnp.float32),
            jax.ShapeDtypeStruct((C, 1), jnp.float32),
            jax.ShapeDtypeStruct((C, 1), jnp.float32),
        ),
        grid_spec=pltpu.PrefetchScalarGridSpec(
            num_scalar_prefetch=0,
            grid=grid,
            in_specs=[x_spec, ch_spec, ch_spec, ch_spec, ch_spec],
            out_specs=[ch_spec, ch_spec, ch_spec, ch_spec],
            scratch_shapes=[pltpu.VMEM((C_TILE, 1), jnp.float32),
                            pltpu.VMEM((C_TILE, 1), jnp.float32)],
        ),
        compiler_params=pltpu.CompilerParams(
            dimension_semantics=("parallel", "arbitrary", "arbitrary")),
    )(x3, g, b, mm, mv)

    # ---- pass 2: y = x * scale + shift (fully parallel, streamed) ----
    y3 = pl.pallas_call(
        _bn_apply_kernel,
        out_shape=jax.ShapeDtypeStruct((N, C, HW), x_nchw.dtype),
        grid_spec=pltpu.PrefetchScalarGridSpec(
            num_scalar_prefetch=0,
            grid=grid,
            in_specs=[x_spec, ch_spec, ch_spec],
            out_specs=x_spec,
        ),
        compiler_params=pltpu.CompilerParams(
            dimension_semantics=("parallel", "parallel", "parallel")),
    )(x3, scale, shift)

    y = y3.reshape(N, C, H, W)
    return (y,
            new_mm.reshape(1, C, 1, 1),
            new_mv.reshape(1, C, 1, 1))


def batch_norm_ref(x, gamma, beta, mm, mv, eps=1e-5, momentum=0.9):
    mean = jnp.mean(x, axis=(0, 2, 3), keepdims=True)
    var = jnp.mean((x - mean) ** 2, axis=(0, 2, 3), keepdims=True)
    x_hat = (x - mean) / jnp.sqrt(var + eps)
    y = gamma * x_hat + beta
    return (y,
            momentum * mm + (1 - momentum) * mean,
            momentum * mv + (1 - momentum) * var)


if __name__ == "__main__":
    # BatchNorm(num_features=4, num_dims=4): params of shape (1, 4, 1, 1)
    N, C, H, W = 2, 4, 16, 16
    key = jax.random.PRNGKey(0)
    x = jax.random.normal(key, (N, C, H, W), dtype=jnp.float32)

    gamma = jnp.ones((1, C, 1, 1), dtype=jnp.float32)         # nn.Parameter(ones)
    beta = jnp.zeros((1, C, 1, 1), dtype=jnp.float32)         # nn.Parameter(zeros)
    moving_mean = jnp.zeros((1, C, 1, 1), dtype=jnp.float32)
    moving_var = jnp.zeros((1, C, 1, 1), dtype=jnp.float32)

    y, new_mm, new_mv = batch_norm_pallas(x, gamma, beta, moving_mean, moving_var)
    jax.block_until_ready((y, new_mm, new_mv))

    y_ref, mm_ref, mv_ref = batch_norm_ref(x, gamma, beta, moving_mean, moving_var)
    assert jnp.allclose(y, y_ref, atol=1e-5, rtol=1e-5)
    assert jnp.allclose(new_mm, mm_ref, atol=1e-6)
    assert jnp.allclose(new_mv, mv_ref, atol=1e-6)

    print("KERNEL_OK")
</pallas_src>

<mosaic_0001>
module attributes {stable_mosaic.version = 11 : i64} {
  func.func @_bn_stats_kernel(%arg0: i32, %arg1: i32, %arg2: i32, %arg3: memref<1x4x256xf32, #tpu.memory_space<vmem>>, %arg4: memref<4x1xf32, #tpu.memory_space<vmem>>, %arg5: memref<4x1xf32, #tpu.memory_space<vmem>>, %arg6: memref<4x1xf32, #tpu.memory_space<vmem>>, %arg7: memref<4x1xf32, #tpu.memory_space<vmem>>, %arg8: memref<4x1xf32, #tpu.memory_space<vmem>>, %arg9: memref<4x1xf32, #tpu.memory_space<vmem>>, %arg10: memref<4x1xf32, #tpu.memory_space<vmem>>, %arg11: memref<4x1xf32, #tpu.memory_space<vmem>>, %arg12: memref<4x1xf32, #tpu.memory_space<vmem>>, %arg13: memref<4x1xf32, #tpu.memory_space<vmem>>) attributes {dimension_semantics = [#tpu.dimension_semantics<parallel>, #tpu.dimension_semantics<arbitrary>, #tpu.dimension_semantics<arbitrary>], iteration_bounds = array<i64: 1, 2, 1>, scalar_prefetch = 0 : i64, scratch_operands = 2 : i64, tpu.core_type = #tpu.core_type<tc>, window_params = [{transform_indices = @transform_0, window_bounds = array<i64: 1, 4, 256>}, {transform_indices = @transform_1, window_bounds = array<i64: 4, 1>}, {transform_indices = @transform_2, window_bounds = array<i64: 4, 1>}, {transform_indices = @transform_3, window_bounds = array<i64: 4, 1>}, {transform_indices = @transform_4, window_bounds = array<i64: 4, 1>}, {transform_indices = @transform_5, window_bounds = array<i64: 4, 1>}, {transform_indices = @transform_6, window_bounds = array<i64: 4, 1>}, {transform_indices = @transform_7, window_bounds = array<i64: 4, 1>}, {transform_indices = @transform_8, window_bounds = array<i64: 4, 1>}]} {
    %c0_i32 = arith.constant 0 : i32
    %0 = arith.cmpi eq, %arg1, %c0_i32 : i32
    %c0_i32_0 = arith.constant 0 : i32
    %1 = arith.cmpi eq, %arg2, %c0_i32_0 : i32
    %2 = arith.andi %0, %1 : i1
    %c1_i32 = arith.constant 1 : i32
    %3 = arith.cmpi eq, %arg1, %c1_i32 : i32
    %c0_i32_1 = arith.constant 0 : i32
    %4 = arith.cmpi eq, %arg2, %c0_i32_1 : i32
    %5 = arith.andi %3, %4 : i1
    %6 = arith.extui %2 : i1 to i32
    %c0_i32_2 = arith.constant 0 : i32
    %7 = arith.cmpi ne, %6, %c0_i32_2 : i32
    scf.if %7 {
      %cst_15 = arith.constant 0.000000e+00 : f32
      %23 = vector.broadcast %cst_15 : f32 to vector<4x1xf32>
      %c0_16 = arith.constant 0 : index
      %c0_17 = arith.constant 0 : index
      %24 = vector.load %arg12[%c0_16, %c0_17] : memref<4x1xf32, #tpu.memory_space<vmem>>, vector<4x1xf32>
      tpu.vector_store %arg12[%c0_16, %c0_17], %23 {strides = array<i32>} : memref<4x1xf32, #tpu.memory_space<vmem>>, vector<4x1xf32>,
      %cst_18 = arith.constant 0.000000e+00 : f32
      %25 = vector.broadcast %cst_18 : f32 to vector<4x1xf32>
      %c0_19 = arith.constant 0 : index
      %c0_20 = arith.constant 0 : index
      %26 = vector.load %arg13[%c0_19, %c0_20] : memref<4x1xf32, #tpu.memory_space<vmem>>, vector<4x1xf32>
      tpu.vector_store %arg13[%c0_19, %c0_20], %25 {strides = array<i32>} : memref<4x1xf32, #tpu.memory_space<vmem>>, vector<4x1xf32>,
    } else {
    }
    %c0 = arith.constant 0 : index
    %c0_3 = arith.constant 0 : index
    %c0_4 = arith.constant 0 : index
    %8 = vector.load %arg3[%c0, %c0_3, %c0_4] : memref<1x4x256xf32, #tpu.memory_space<vmem>>, vector<1x4x256xf32>
    %9 = vector.shape_cast %8 : vector<1x4x256xf32> to vector<4x256xf32>
    %c0_5 = arith.constant 0 : index
    %c0_6 = arith.constant 0 : index
    %10 = vector.load %arg12[%c0_5, %c0_6] : memref<4x1xf32, #tpu.memory_space<vmem>>, vector<4x1xf32>
    %cst = arith.constant dense<0.000000e+00> : vector<4xf32>
    %11 = vector.multi_reduction <add>, %9, %cst [1] : vector<4x256xf32> to vector<4xf32>
    %12 = vector.shape_cast %11 : vector<4xf32> to vector<4x1xf32>
    %13 = arith.addf %10, %12 : vector<4x1xf32>
    %c0_7 = arith.constant 0 : index
    %c0_8 = arith.constant 0 : index
    %14 = vector.load %arg12[%c0_7, %c0_8] : memref<4x1xf32, #tpu.memory_space<vmem>>, vector<4x1xf32>
    tpu.vector_store %arg12[%c0_7, %c0_8], %13 {strides = array<i32>} : memref<4x1xf32, #tpu.memory_space<vmem>>, vector<4x1xf32>,
    %c0_9 = arith.constant 0 : index
    %c0_10 = arith.constant 0 : index
    %15 = vector.load %arg13[%c0_9, %c0_10] : memref<4x1xf32, #tpu.memory_space<vmem>>, vector<4x1xf32>
    %16 = arith.mulf %9, %9 : vector<4x256xf32>
    %cst_11 = arith.constant dense<0.000000e+00> : vector<4xf32>
    %17 = vector.multi_reduction <add>, %16, %cst_11 [1] : vector<4x256xf32> to vector<4xf32>
    %18 = vector.shape_cast %17 : vector<4xf32> to vector<4x1xf32>
    %19 = arith.addf %15, %18 : vector<4x1xf32>
    %c0_12 = arith.constant 0 : index
    %c0_13 = arith.constant 0 : index
    %20 = vector.load %arg13[%c0_12, %c0_13] : memref<4x1xf32, #tpu.memory_space<vmem>>, vector<4x1xf32>
    tpu.vector_store %arg13[%c0_12, %c0_13], %19 {strides = array<i32>} : memref<4x1xf32, #tpu.memory_space<vmem>>, vector<4x1xf32>,
    %21 = arith.extui %5 : i1 to i32
    %c0_i32_14 = arith.constant 0 : i32
    %22 = arith.cmpi ne, %21, %c0_i32_14 : i32
    scf.if %22 {
      %c0_15 = arith.constant 0 : index
      %c0_16 = arith.constant 0 : index
      %23 = vector.load %arg12[%c0_15, %c0_16] : memref<4x1xf32, #tpu.memory_space<vmem>>, vector<4x1xf32>
      %cst_17 = arith.constant 0.001953125 : f32
      %24 = vector.broadcast %cst_17 : f32 to vector<4x1xf32>
      %25 = arith.mulf %23, %24 : vector<4x1xf32>
      %c0_18 = arith.constant 0 : index
      %c0_19 = arith.constant 0 : index
      %26 = vector.load %arg13[%c0_18, %c0_19] : memref<4x1xf32, #tpu.memory_space<vmem>>, vector<4x1xf32>
      %cst_20 = arith.constant 0.001953125 : f32
      %27 = vector.broadcast %cst_20 : f32 to vector<4x1xf32>
      %28 = arith.mulf %26, %27 : vector<4x1xf32>
      %29 = arith.mulf %25, %25 : vector<4x1xf32>
      %30 = arith.subf %28, %29 : vector<4x1xf32>
      %cst_21 = arith.constant 0.000000e+00 : f32
      %31 = vector.broadcast %cst_21 : f32 to vector<4x1xf32>
      %32 = arith.maximumf %30, %31 : vector<4x1xf32>
      %cst_22 = arith.constant 9.99999974E-6 : f32
      %33 = vector.broadcast %cst_22 : f32 to vector<4x1xf32>
      %34 = arith.addf %32, %33 : vector<4x1xf32>
      %35 = math.rsqrt %34 : vector<4x1xf32>
      %c0_23 = arith.constant 0 : index
      %c0_24 = arith.constant 0 : index
      %36 = vector.load %arg4[%c0_23, %c0_24] : memref<4x1xf32, #tpu.memory_space<vmem>>, vector<4x1xf32>
      %c0_25 = arith.constant 0 : index
      %c0_26 = arith.constant 0 : index
      %37 = vector.load %arg5[%c0_25, %c0_26] : memref<4x1xf32, #tpu.memory_space<vmem>>, vector<4x1xf32>
      %38 = arith.mulf %36, %35 : vector<4x1xf32>
      %c0_27 = arith.constant 0 : index
      %c0_28 = arith.constant 0 : index
      %39 = vector.load %arg8[%c0_27, %c0_28] : memref<4x1xf32, #tpu.memory_space<vmem>>, vector<4x1xf32>
      tpu.vector_store %arg8[%c0_27, %c0_28], %38 {strides = array<i32>} : memref<4x1xf32, #tpu.memory_space<vmem>>, vector<4x1xf32>,
      %40 = arith.mulf %25, %38 : vector<4x1xf32>
      %41 = arith.subf %37, %40 : vector<4x1xf32>
      %c0_29 = arith.constant 0 : index
      %c0_30 = arith.constant 0 : index
      %42 = vector.load %arg9[%c0_29, %c0_30] : memref<4x1xf32, #tpu.memory_space<vmem>>, vector<4x1xf32>
      tpu.vector_store %arg9[%c0_29, %c0_30], %41 {strides = array<i32>} : memref<4x1xf32, #tpu.memory_space<vmem>>, vector<4x1xf32>,
      %c0_31 = arith.constant 0 : index
      %c0_32 = arith.constant 0 : index
      %43 = vector.load %arg6[%c0_31, %c0_32] : memref<4x1xf32, #tpu.memory_space<vmem>>, vector<4x1xf32>
      %c0_33 = arith.constant 0 : index
      %c0_34 = arith.constant 0 : index
      %44 = vector.load %arg7[%c0_33, %c0_34] : memref<4x1xf32, #tpu.memory_space<vmem>>, vector<4x1xf32>
      %cst_35 = arith.constant 0.899999976 : f32
      %45 = vector.broadcast %cst_35 : f32 to vector<4x1xf32>
      %46 = arith.mulf %45, %43 : vector<4x1xf32>
      %cst_36 = arith.constant 1.000000e-01 : f32
      %47 = vector.broadcast %cst_36 : f32 to vector<4x1xf32>
      %48 = arith.mulf %47, %25 : vector<4x1xf32>
      %49 = arith.addf %46, %48 : vector<4x1xf32>
      %c0_37 = arith.constant 0 : index
      %c0_38 = arith.constant 0 : index
      %50 = vector.load %arg10[%c0_37, %c0_38] : memref<4x1xf32, #tpu.memory_space<vmem>>, vector<4x1xf32>
      tpu.vector_store %arg10[%c0_37, %c0_38], %49 {strides = array<i32>} : memref<4x1xf32, #tpu.memory_space<vmem>>, vector<4x1xf32>,
      %cst_39 = arith.constant 0.899999976 : f32
      %51 = vector.broadcast %cst_39 : f32 to vector<4x1xf32>
      %52 = arith.mulf %51, %44 : vector<4x1xf32>
      %cst_40 = arith.constant 1.000000e-01 : f32
      %53 = vector.broadcast %cst_40 : f32 to vector<4x1xf32>
      %54 = arith.mulf %53, %32 : vector<4x1xf32>
      %55 = arith.addf %52, %54 : vector<4x1xf32>
      %c0_41 = arith.constant 0 : index
      %c0_42 = arith.constant 0 : index
      %56 = vector.load %arg11[%c0_41, %c0_42] : memref<4x1xf32, #tpu.memory_space<vmem>>, vector<4x1xf32>
      tpu.vector_store %arg11[%c0_41, %c0_42], %55 {strides = array<i32>} : memref<4x1xf32, #tpu.memory_space<vmem>>, vector<4x1xf32>,
    } else {
    }
    return
  }
  func.func @transform_0(%arg0: i32, %arg1: i32, %arg2: i32) -> (i32, i32, i32) {
    %c0_i32 = arith.constant 0 : i32
    return %arg1, %arg0, %arg2 : i32, i32, i32
  }
  func.func @transform_1(%arg0: i32, %arg1: i32, %arg2: i32) -> (i32, i32) {
    %c0_i32 = arith.constant 0 : i32
    %c0_i32_0 = arith.constant 0 : i32
    return %arg0, %c0_i32 : i32, i32
  }
  func.func @transform_2(%arg0: i32, %arg1: i32, %arg2: i32) -> (i32, i32) {
    %c0_i32 = arith.constant 0 : i32
    %c0_i32_0 = arith.constant 0 : i32
    return %arg0, %c0_i32 : i32, i32
  }
  func.func @transform_3(%arg0: i32, %arg1: i32, %arg2: i32) -> (i32, i32) {
    %c0_i32 = arith.constant 0 : i32
    %c0_i32_0 = arith.constant 0 : i32
    return %arg0, %c0_i32 : i32, i32
  }
  func.func @transform_4(%arg0: i32, %arg1: i32, %arg2: i32) -> (i32, i32) {
    %c0_i32 = arith.constant 0 : i32
    %c0_i32_0 = arith.constant 0 : i32
    return %arg0, %c0_i32 : i32, i32
  }
  func.func @transform_5(%arg0: i32, %arg1: i32, %arg2: i32) -> (i32, i32) {
    %c0_i32 = arith.constant 0 : i32
    %c0_i32_0 = arith.constant 0 : i32
    return %arg0, %c0_i32 : i32, i32
  }
  func.func @transform_6(%arg0: i32, %arg1: i32, %arg2: i32) -> (i32, i32) {
    %c0_i32 = arith.constant 0 : i32
    %c0_i32_0 = arith.constant 0 : i32
    return %arg0, %c0_i32 : i32, i32
  }
  func.func @transform_7(%arg0: i32, %arg1: i32, %arg2: i32) -> (i32, i32) {
    %c0_i32 = arith.constant 0 : i32
    %c0_i32_0 = arith.constant 0 : i32
    return %arg0, %c0_i32 : i32, i32
  }
  func.func @transform_8(%arg0: i32, %arg1: i32, %arg2: i32) -> (i32, i32) {
    %c0_i32 = arith.constant 0 : i32
    %c0_i32_0 = arith.constant 0 : i32
    return %arg0, %c0_i32 : i32, i32
  }
}

</mosaic_0001>

<bundles_post_ra>
// kernel: tpu_custom_call.1
= control target key start
LH: loop header
LB: loop body
LE: loop exit
PB: predicated region body
PF: predicated region fallthrough
CT: control target
= control target key end

     0   :  { %14 = vsyncpa [#allocation5], 0  ;;  %s1080_s0 = inlined_call_operand.hbm [shape: f32[2,4,256], index: 0, kind: input, shape index: {}]   ;;  %s1081_s1 = inlined_call_operand.vmem [shape: f32[4,1], index: 1, kind: input, shape index: {}]   ;;  %s1082_s2 = inlined_call_operand.vmem [shape: f32[4,1], index: 2, kind: input, shape index: {}]   ;;  %s1083_s3 = inlined_call_operand.vmem [shape: f32[4,1], index: 3, kind: input, shape index: {}]   ;;  %s1084_s4 = inlined_call_operand.vmem [shape: f32[4,1], index: 4, kind: input, shape index: {}]   ;;  %s1085_s5 = inlined_call_operand.vmem [shape: f32[4,1], index: 5, kind: output, shape index: {0}]   ;;  %s1086_s6 = inlined_call_operand.vmem [shape: f32[4,1], index: 6, kind: output, shape index: {1}]   ;;  %s1087_s7 = inlined_call_operand.vmem [shape: f32[4,1], index: 7, kind: output, shape index: {2}]   ;;  %s1088_s8 = inlined_call_operand.vmem [shape: f32[4,1], index: 8, kind: output, shape index: {3}]  }
   0x1   :  { %16 = vsyncpa [#allocation5 + $0x1], 0  ;;  %s963_s27 = smov 0   ;;  %s965_s28 = smov 0  }
   0x2   :  { %s967_s29 = smov 0   ;;  %s969_s30 = smov 0  }
   0x3   :  { %s971_s9 = smov 0   ;;  %s973_s10 = smov 0  }
   0x4 LB: > { %s754_s11 = sadd.s32 4294967295, %s915_s10   ;;  %s37_s12 = sadd.s32 1, %s911_s9  ;;  %s915_s10 = sphi %s973_s10, %s22_s10   ;;  %s911_s9 = sphi %s971_s9, %s1095_s9   ;;  %s907_s30 = sphi %s969_s30, %s1094_s30   ;;  %s903_s29 = sphi %s967_s29, %s1093_s29   ;;  %s899_s28 = sphi %s965_s28, %s1092_s28   ;;  %s895_s27 = sphi %s963_s27, %s1091_s27  }
   0x5   : > { %p39_p0 = scmp.ge.s32.totalorder %s37_s12, 2  ;;  %s52_s13 = sadd.s32 1, %s903_s29 }
   0x6   : > { %p59_p1 = scmp.ne.s32.totalorder %s903_s29, %s899_s28  ;;  %p60_p2 = scmp.eq.s32.totalorder %s915_s10, 0 }
   0x7   : > { %s1097_s12 = smov (%p39_p0, %s37_s12), 0  ;;  %p65_p4 = scmp.ne.s32.totalorder %s899_s28, %s895_s27 }
   0x8   : > { %p999_p3 = por %p60_p2, %p59_p1  ;;  %s45_s15 = ssub.s32 %s911_s9, %s1097_s12 }
   0x9   : > { %p66_p5 = scmp.eq.s32.totalorder %s754_s11, 0  ;;  %p50_p6 = scmp.eq.s32.totalorder %s45_s15, 0 }
   0xa   : > { %p783_p8 = scmp.lt.s32.totalorder %s915_s10, 2  ;;  %s325_s18 = sand.u32 1, %s903_s29  }
   0xb   : > { %p1006_p7 = por %p66_p5, %p65_p4  ;;  %s774_s19 = sshll.u32 %s911_s9, 3 }
   0xc   : > { %s1012_s17 = scalar_select %p50_p6, %s903_s29, %s52_s13  }
   0xd   : > { %s761_s20 = sshll.u32 %s325_s18, 3  ;;  %s338_s23 = scalar_lea.hbm %s1080_s0, %s774_s19 }
   0xe   : > { %s340_s24 = sshll.u32 %s338_s23, 4  ;;  %s329_s25 = scalar_lea.vmem [#allocation4], %s761_s20  ;;  %s341_s24 = int_to_ptr.hbm [resolvable:$true] %s340_s24 }
   0xf   : > { %s342_s26 = sshll.u32 %s329_s25, 4  ;;  %p780_p9 = pnand %p783_p8, %p999_p3  ;;  %s343_s26 = int_to_ptr.vmem [resolvable:$true] %s342_s26 }
  0x10   : > { %p764_p10 = scmp.ge.s32.totalorder %s915_s10, 1  ;;  %p347_p11 = scmp.lt.s32.totalorder %s915_s10, 3 }
  0x11   : > { %s326_s27 = scalar_lea.sflag [#allocation5], %s325_s18 }
  0x12   : > { %782 = dma.hbm_to_vmem [thread:$0]  (!%p780_p9), %s341_s24, 128, %s343_s26, %s326_s27  }
  0x13   : > { %p348_p12 = pnand %p764_p10, %p347_p11 }
  0x14   : > { %s353_s11 = sand.u32 (!%p348_p12), 1, %s899_s28  }
  0x15   : > { %351 = sbr.rel (%p348_p12) target bundleno = 213 (0xd5), region = 40  ;;  %s765_s13 = sshll.u32 (!%p348_p12), %s353_s11, 3 }
  0x16   : > { %s354_s15 = scalar_lea.sflag (!%p348_p12), [#allocation5], %s353_s11  ;;  %s357_s21 = scalar_lea.vmem (!%p348_p12), [#allocation4], %s765_s13 }
  0x1a   : > { %890 = dma.done.wait (%p1006_p7), %s354_s15, 128  }
  0x1b   : > { %892 = vsyncadd (%p1006_p7), %s354_s15, 4294967168  ;;  %p451_p13 = scmp.eq.s32.totalorder %s907_s30, 0  ;;  %p455_p0 = scmp.eq.s32.totalorder %s907_s30, 1 }
  0x1c   : > { %vm460_vm0 = vcmask (%p451_p13), 3072   ;;  %v917_v0 = vmov (%p451_p13), 0.0  }
  0x1d   : > { %459 = sbr.rel (!%p451_p13) target bundleno = 34 (0x22), region = 48  ;;  %461 = vst.msk [vmem:[#allocation2] sm:$0xf] (%p451_p13), %vm460_vm0, %v917_v0 }
  0x1e   : > { %462 = vst.msk [vmem:[#allocation3] sm:$0xf] (%p451_p13), %vm460_vm0, %v917_v0 }
  0x22 PF: > { %v463_v1 = vld [vmem:[%s357_s21] sm:$0xff]  ;;  %vm471_vm1 = vcmask 1043456   ;;  %vm478_vm2 = vcmask 3072   ;;  %v522_v23 = vld [vmem:[%s1083_s3] sm:$0xf] (%p455_p0) }
  0x23   : > { %466 = vst [vmem:[#allocation1] ss:$2 sm:$0xff] %v463_v1  ;;  %v481_v2 = vmul.f32 %v463_v1, %v463_v1  ;;  %v524_v24 = vmul.f32 (%p455_p0), 0.9, %v522_v23  ;;  %v523_v27 = vld [vmem:[%s1084_s4] sm:$0xf] (%p455_p0) }
  0x24   : > { %v464_v13 = vld [vmem:[#allocation2] sm:$0xf]  ;;  %v528_v31 = vmul.f32 (%p455_p0), 0.9, %v523_v27  ;;  %v515_v41 = vld [vmem:[%s1081_s1] sm:$0xf] (%p455_p0) }
  0x25   : > { %v480_v16 = vld [vmem:[#allocation3] sm:$0xf]  ;;  %v516_v44 = vld [vmem:[%s1082_s2] sm:$0xf] (%p455_p0) }
  0x2a   : > { %v467_v3 = vld.sshfl [vmem:[#allocation1] sm:$0xff pattern:$0x75316420]  ;;  %v468_v4 = vld.sshfl [vmem:[#allocation1 + $0x8] sm:$0xff pattern:$0x75316420] }
  0x2b   : > { %v472_v5 = vsel %vm471_vm1, %v467_v3, 0.0  ;;  %v473_v6 = vsel %vm471_vm1, %v468_v4, 0.0  ;;  %483 = vst [vmem:[#allocation1] ss:$2 sm:$0xff] %v481_v2 }
  0x2c   : > { %v474_v7 = vadd.f32 %v473_v6, %v472_v5 }
  0x2e   : > { %475 = vadd.xlane.f32.xlu0 %v474_v7 }
  0x32   : > { %v484_v8 = vld.sshfl [vmem:[#allocation1] sm:$0xff pattern:$0x75316420]  ;;  %v485_v9 = vld.sshfl [vmem:[#allocation1 + $0x8] sm:$0xff pattern:$0x75316420] }
  0x33   : > { %v488_v10 = vsel %vm471_vm1, %v484_v8, 0.0  ;;  %v489_v11 = vsel %vm471_vm1, %v485_v9, 0.0 }
  0x34   : > { %v490_v12 = vadd.f32 %v489_v11, %v488_v10 }
  0x36   : > { %491 = vadd.xlane.f32.xlu0 %v490_v12 }
  0xa1   : > { %v476_v14 = vpop.xlane.xlu0 %475 }
  0xa2   : > { %v477_v15 = vadd.f32 %v476_v14, %v464_v13 }
  0xa4   : > { %479 = vst.msk [vmem:[#allocation2] sm:$0xf] %vm478_vm2, %v477_v15 }
  0xa8   : > { %496 = sbr.rel (!%p455_p0) target bundleno = 213 (0xd5), region = 52 }
  0xa9   : > { %v492_v17 = vpop.xlane.xlu0 %491 }
  0xaa   : > { %v493_v18 = vadd.f32 %v492_v17, %v480_v16 }
  0xab   : > { %v497_v19 = vld [vmem:[#allocation2] sm:$0xf] (%p455_p0) }
  0xac   : > { %494 = vst.msk [vmem:[#allocation3] sm:$0xf] %vm478_vm2, %v493_v18  ;;  %v498_v21 = vmul.f32 (%p455_p0), 0.001953125, %v497_v19 }
  0xae   : > { %v501_v25 = vmul.f32 %v498_v21, %v498_v21  ;;  %v525_v26 = vmul.f32 0.1, %v498_v21 }
  0xb0   : > { %v526_v29 = vadd.f32 %v525_v26, %v524_v24 }
  0xb2   : > { %527 = vst.msk [vmem:[%s1087_s7] sm:$0xf] %vm478_vm2, %v526_v29 }
  0xb3   : > { %v499_v20 = vld [vmem:[#allocation3] sm:$0xf] }
  0xb4   : > { %v500_v22 = vmul.f32 0.001953125, %v499_v20 }
  0xb6   : > { %v502_v28 = vsub.f32 %v500_v22, %v501_v25 }
  0xb8   : > { %v503_v30 = vmax.f32 %v502_v28, 0.0 }
  0xba   : > { %v504_v32 = vadd.f32 1e-05, %v503_v30  ;;  %v529_v33 = vmul.f32 0.1, %v503_v30 }
  0xbc   : > { %833 = vrsqrt.f32 %v504_v32  ;;  %v530_v34 = vadd.f32 %v529_v33, %v528_v31  ;;  %vm511_vm3 = vweird.f32 %v504_v32 }
  0xbe   : > { %531 = vst.msk [vmem:[%s1088_s8] sm:$0xf] %vm478_vm2, %v530_v34 }
  0xc2   : > { %v834_v35 = vpop.eup %833 }
  0xc3   : > { %v506_v36 = vmul.f32 %v834_v35, %v504_v32  ;;  %vm512_vm4 = vweird.f32 %v834_v35 }
  0xc4   : > { %vm513_vm5 = vmor %vm511_vm3, %vm512_vm4 }
  0xc5   : > { %v507_v37 = vmul.f32 %v834_v35, %v506_v36 }
  0xc7   : > { %v508_v38 = vmul.f32 0.5, %v507_v37 }
  0xc9   : > { %v509_v39 = vsub.f32 1.5, %v508_v38 }
  0xcb   : > { %v510_v40 = vmul.f32 %v834_v35, %v509_v39 }
  0xcd   : > { %v514_v42 = vsel %vm513_vm5, %v834_v35, %v510_v40 }
  0xce   : > { %v517_v43 = vmul.f32 %v515_v41, %v514_v42 }
  0xd0   : > { %518 = vst.msk [vmem:[%s1085_s5] sm:$0xf] %vm478_vm2, %v517_v43  ;;  %v519_v45 = vmul.f32 %v517_v43, %v498_v21 }
  0xd2   : > { %v520_v46 = vsub.f32 %v516_v44, %v519_v45 }
  0xd4   : > { %521 = vst.msk [vmem:[%s1086_s6] sm:$0xf] %vm478_vm2, %v520_v46 }
  0xd5 PF: > { %s22_s10 = sadd.s32 1, %s915_s10   ;;  %s1091_s27 = smov %s899_s28 }
  0xd6   : > { %p19_p1 = scmp.ge.s32.totalorder %s22_s10, 4   ;;  %s1092_s28 = smov %s903_s29 }
  0xd7   : > { %s1093_s29 = smov %s1012_s17  ;;  %s1094_s30 = smov %s911_s9 }
  0xd8   : > { %s1095_s9 = smov %s1097_s12  ;;  %21 = sbr.rel (!%p19_p1) target bundleno = 4 (0x4), region = 136 }
  0xdd   :  { %593 = vsyncpa [#allocation5], 1 }
  0xde   :  { %595 = vsyncpa [#allocation5 + $0x1], 1 }

</bundles_post_ra>
